<compile_context>
chip_gen: v6e
topology: v6e:2x2x1
jax: 0.10.0
libtpu: 0.0.40
codegen_flags: <defaults>
</compile_context>

<pallas_src>
import functools
import math

import jax
import jax.numpy as jnp
from jax.experimental import pallas as pl
from jax.experimental.pallas import tpu as pltpu

_LANE = 128


def _round_up(v, m):
    return ((v + m - 1) // m) * m


# ----------------------------------------------------------------------------
# Fused kernel: all bidirectional RNN layers, seq_len == 1, zero initial state.
# ----------------------------------------------------------------------------
def _make_fused_rnn_kernel(num_layers):
    """Kernel ref layout (positional):
         refs[0]                         x     (bm, F)       f32
         refs[1 .. L]                    w_l   (K_l, Npad)   bf16  (cols = [fwd | bwd | 0-pad])
         refs[1+L .. 2L]                 b_l   (1, Npad)     f32   (= b_ih + b_hh, 0-padded)
         refs[-1]                        out   (bm, Npad)    f32
       Padded columns stay exactly zero: acc_pad = 0, bias_pad = 0, tanh(0) = 0,
       and the next layer's weight rows for those columns are zero.
    """
    def kernel(*refs):
        x_ref = refs[0]
        w_refs = refs[1:1 + num_layers]
        b_refs = refs[1 + num_layers:1 + 2 * num_layers]
        out_ref = refs[-1]

        h = x_ref[...].astype(jnp.bfloat16)                  # bf16 MXU operand
        h_f32 = None
        for layer in range(num_layers):                      # static unroll
            acc = jnp.dot(h, w_refs[layer][...],
                          preferred_element_type=jnp.float32)        # MXU, f32 acc
            h_f32 = jnp.tanh(acc + b_refs[layer][...])                # f32 VPU + EUP
            if layer + 1 < num_layers:
                h = h_f32.astype(jnp.bfloat16)               # stays in vregs, no HBM
        out_ref[...] = h_f32                                 # full-lane (Npad=128k) store

    return kernel


def birnn_forward_pallas(x2d, packed_params, *, batch_block=256):
    """x2d: (B, F) f32.  packed_params: tuple of (w bf16 (K, Npad), b f32 (1, Npad))."""
    num_layers = len(packed_params)
    batch, feat = x2d.shape
    n_pad = packed_params[0][0].shape[1]

    # Batch tiling: only for large stacked batches (v7x megacore lever); tiny
    # batches use one full-array block.
    if batch >= 2 * batch_block and batch % batch_block == 0:
        bm = batch_block
    else:
        bm = batch
    grid = (batch // bm,)

    w_list = [w for w, _ in packed_params]
    b_list = [b for _, b in packed_params]

    in_specs = [pl.BlockSpec((bm, feat), lambda i: (i, 0))]
    in_specs += [pl.BlockSpec(w.shape, lambda i: (0, 0)) for w in w_list]
    in_specs += [pl.BlockSpec(b.shape, lambda i: (0, 0)) for b in b_list]
    out_specs = pl.BlockSpec((bm, n_pad), lambda i: (i, 0))

    # Advisory cost hint so XLA schedules around this tiny custom call.
    flops = sum(2 * batch * w.shape[0] * w.shape[1] for w in w_list)
    transcendentals = sum(batch * w.shape[1] for w in w_list)
    bytes_accessed = (x2d.size * 4 + batch * n_pad * 4
                      + sum(w.size * 2 for w in w_list)
                      + sum(b.size * 4 for b in b_list))

    # VMEM footprint guard (x/out blocks double-buffered by the pipeline).
    vmem_bytes = 2 * (bm * feat * 4 + bm * n_pad * 4)
    vmem_bytes += sum(2 * w.size * 2 for w in w_list) + sum(2 * b.size * 4 for b in b_list)
    # TODO(synk): K-tiled grid + f32 VMEM accumulator fallback for huge input_size.
    assert vmem_bytes < 12 * 1024 * 1024, f"VMEM footprint too large: {vmem_bytes} bytes"

    return pl.pallas_call(
        _make_fused_rnn_kernel(num_layers),
        out_shape=jax.ShapeDtypeStruct((batch, n_pad), jnp.float32),
        grid=grid,
        in_specs=in_specs,
        out_specs=out_specs,
        compiler_params=pltpu.CompilerParams(dimension_semantics=("parallel",)),
        cost_estimate=pl.CostEstimate(flops=flops, transcendentals=transcendentals,
                                      bytes_accessed=bytes_accessed),
    )(x2d, *w_list, *b_list)


# ----------------------------------------------------------------------------
# Forward pass (jitted): flatten to seq_len=1 features, run fused kernel, slice.
# ----------------------------------------------------------------------------
@functools.partial(jax.jit, static_argnames=("out_width",))
def rnn_forward(x, packed_params, out_width):
    """Reproduces Rnn.forward: returns (B, num_dir * hidden)."""
    batch = x.shape[0]
    x2d = x.reshape(batch, -1).astype(jnp.float32)     # == x.view(B, 1, -1)[:, 0, :]
    out_padded = birnn_forward_pallas(x2d, packed_params)  # (B, Npad), ONE pallas_call
    return out_padded[:, :out_width]


# ----------------------------------------------------------------------------
# Parameter handling.
# ----------------------------------------------------------------------------
def init_rnn_params(key, input_size, hidden, num_layers, bidirectional):
    """Deterministic U(-1/sqrt(H), 1/sqrt(H)) init, matching nn.RNN param shapes."""
    num_dir = 2 if bidirectional else 1
    k = 1.0 / math.sqrt(hidden)
    params = {}
    for layer in range(num_layers):
        in_size = input_size if layer == 0 else num_dir * hidden
        for direction in range(num_dir):
            key, k1, k2, k3, k4 = jax.random.split(key, 5)
            params[(layer, direction)] = (
                jax.random.uniform(k1, (hidden, in_size), jnp.float32, -k, k),  # W_ih
                jax.random.uniform(k2, (hidden, hidden), jnp.float32, -k, k),   # W_hh (dead: h0==0, seq_len==1)
                jax.random.uniform(k3, (hidden,), jnp.float32, -k, k),          # b_ih
                jax.random.uniform(k4, (hidden,), jnp.float32, -k, k),          # b_hh
            )
    return params


def pack_rnn_params(params, input_size, hidden, num_layers, bidirectional):
    """One-time packing: per layer W = concat_dir(W_ih^T) in bf16, b = concat_dir(b_ih+b_hh),
    both zero-padded to 128 output lanes.  Layer>0 weights also zero-pad the K dim
    to match the padded intermediate width."""
    num_dir = 2 if bidirectional else 1
    out_width = num_dir * hidden
    n_pad = _round_up(out_width, _LANE)
    packed = []
    for layer in range(num_layers):
        in_size = input_size if layer == 0 else out_width
        k_dim = input_size if layer == 0 else n_pad
        w_full = jnp.zeros((k_dim, n_pad), jnp.float32)
        b_full = jnp.zeros((1, n_pad), jnp.float32)
        for d in range(num_dir):
            w_ih, _w_hh, b_ih, b_hh = params[(layer, d)]
            w_full = w_full.at[:in_size, d * hidden:(d + 1) * hidden].set(jnp.transpose(w_ih))
            b_full = b_full.at[0, d * hidden:(d + 1) * hidden].set(b_ih + b_hh)
        packed.append((w_full.astype(jnp.bfloat16), b_full))
    return tuple(packed), out_width


# ----------------------------------------------------------------------------
# Pure-JAX references.
# ----------------------------------------------------------------------------
def rnn_forward_ref_f32(x, params, num_layers, hidden, bidirectional):
    """Exact PyTorch semantics (f32 weights, zero h0, seq_len == 1)."""
    batch = x.shape[0]
    layer_in = x.reshape(batch, -1).astype(jnp.float32)
    num_dir = 2 if bidirectional else 1
    for layer in range(num_layers):
        outs = []
        for direction in range(num_dir):
            w_ih, _w_hh, b_ih, b_hh = params[(layer, direction)]
            outs.append(jnp.tanh(layer_in @ w_ih.T + b_ih + b_hh))
        layer_in = jnp.concatenate(outs, axis=-1) if num_dir == 2 else outs[0]
    return layer_in


def rnn_forward_ref_packed(x, packed_params, out_width):
    """Same math as the kernel (bf16 operands, f32 accumulation, padded lanes)."""
    batch = x.shape[0]
    h = x.reshape(batch, -1).astype(jnp.float32).astype(jnp.bfloat16)
    h_f32 = None
    for w, b in packed_params:
        acc = jnp.dot(h, w, preferred_element_type=jnp.float32)
        h_f32 = jnp.tanh(acc + b)
        h = h_f32.astype(jnp.bfloat16)
    return h_f32[:, :out_width]


if __name__ == "__main__":
    key = jax.random.PRNGKey(0)

    # ---- Case 1: module defaults (B=2, NCHW input, 1 bidirectional layer) ----
    B, C, H, W = 2, 4, 16, 16
    hidden_size, num_layers, bidirectional = 32, 1, True
    input_size = C * H * W                       # 1024

    key, xkey, pkey = jax.random.split(key, 3)
    x = jax.random.normal(xkey, (B, C, H, W), jnp.float32)
    params = init_rnn_params(pkey, input_size, hidden_size, num_layers, bidirectional)
    packed, out_width = pack_rnn_params(params, input_size, hidden_size,
                                        num_layers, bidirectional)

    out = jax.block_until_ready(rnn_forward(x, packed, out_width=out_width))
    assert out.shape == (B, out_width), out.shape

    # Tight check: kernel vs identical-precision JAX math (bf16 MXU, f32 acc).
    ref_tight = rnn_forward_ref_packed(x, packed, out_width)
    assert jnp.allclose(out, ref_tight, atol=1e-4, rtol=1e-4), \
        float(jnp.max(jnp.abs(out - ref_tight)))
    # Loose check vs exact f32 PyTorch semantics (bounds bf16 quantization error).
    ref_f32 = rnn_forward_ref_f32(x, params, num_layers, hidden_size, bidirectional)
    assert jnp.allclose(out, ref_f32, atol=5e-2, rtol=0.0), \
        float(jnp.max(jnp.abs(out - ref_f32)))

    # ---- Case 2: exercise fused multi-layer path + large stacked batch grid ----
    B2, num_layers2 = 512, 2
    key, xkey2, pkey2 = jax.random.split(key, 3)
    x2 = jax.random.normal(xkey2, (B2, C, H, W), jnp.float32)
    params2 = init_rnn_params(pkey2, input_size, hidden_size, num_layers2, bidirectional)
    packed2, out_width2 = pack_rnn_params(params2, input_size, hidden_size,
                                          num_layers2, bidirectional)

    out2 = jax.block_until_ready(rnn_forward(x2, packed2, out_width=out_width2))
    assert out2.shape == (B2, out_width2), out2.shape
    ref2_tight = rnn_forward_ref_packed(x2, packed2, out_width2)
    assert jnp.allclose(out2, ref2_tight, atol=5e-3, rtol=1e-3), \
        float(jnp.max(jnp.abs(out2 - ref2_tight)))
    ref2_f32 = rnn_forward_ref_f32(x2, params2, num_layers2, hidden_size, bidirectional)
    assert jnp.allclose(out2, ref2_f32, atol=1e-1, rtol=0.0), \
        float(jnp.max(jnp.abs(out2 - ref2_f32)))

    print("KERNEL_OK")
</pallas_src>

<mosaic_0001>
module attributes {stable_mosaic.version = 11 : i64} {
  func.func @kernel(%arg0: i32, %arg1: memref<2x1024xf32, #tpu.memory_space<vmem>>, %arg2: memref<1024x128xbf16, #tpu.memory_space<vmem>>, %arg3: memref<1x128xf32, #tpu.memory_space<vmem>>, %arg4: memref<2x128xf32, #tpu.memory_space<vmem>>) attributes {dimension_semantics = [#tpu.dimension_semantics<parallel>], iteration_bounds = array<i64: 1>, scalar_prefetch = 0 : i64, scratch_operands = 0 : i64, tpu.core_type = #tpu.core_type<tc>, window_params = [{transform_indices = @transform_0, window_bounds = array<i64: 2, 1024>}, {pipeline_mode = #tpu.pipeline_mode<synchronous>, transform_indices = @transform_1, window_bounds = array<i64: 1024, 128>}, {pipeline_mode = #tpu.pipeline_mode<synchronous>, transform_indices = @transform_2, window_bounds = array<i64: 1, 128>}, {transform_indices = @transform_3, window_bounds = array<i64: 2, 128>}]} {
    %c0 = arith.constant 0 : index
    %c0_0 = arith.constant 0 : index
    %0 = vector.load %arg1[%c0, %c0_0] : memref<2x1024xf32, #tpu.memory_space<vmem>>, vector<2x1024xf32>
    %1 = arith.truncf %0 : vector<2x1024xf32> to vector<2x1024xbf16>
    %c0_1 = arith.constant 0 : index
    %c0_2 = arith.constant 0 : index
    %2 = vector.load %arg2[%c0_1, %c0_2] : memref<1024x128xbf16, #tpu.memory_space<vmem>>, vector<1024x128xbf16>
    %cst = arith.constant dense<0.000000e+00> : vector<2x128xf32>
    %3 = tpu.matmul %1, %2, %cst {dimension_numbers = #tpu.dot_dimension_numbers<[1], [0], [0], [1], [0, 0, 1, 1], [], []>} : vector<2x1024xbf16>, vector<1024x128xbf16>, vector<2x128xf32> -> vector<2x128xf32>
    %c0_3 = arith.constant 0 : index
    %c0_4 = arith.constant 0 : index
    %4 = vector.load %arg3[%c0_3, %c0_4] : memref<1x128xf32, #tpu.memory_space<vmem>>, vector<1x128xf32>
    %5 = vector.broadcast %4 : vector<1x128xf32> to vector<2x128xf32>
    %6 = arith.addf %3, %5 : vector<2x128xf32>
    %7 = math.tanh %6 : vector<2x128xf32>
    %c0_5 = arith.constant 0 : index
    %c0_6 = arith.constant 0 : index
    %8 = vector.load %arg4[%c0_5, %c0_6] : memref<2x128xf32, #tpu.memory_space<vmem>>, vector<2x128xf32>
    tpu.vector_store %arg4[%c0_5, %c0_6], %7 {strides = array<i32>} : memref<2x128xf32, #tpu.memory_space<vmem>>, vector<2x128xf32>,
    return
  }
  func.func @transform_0(%arg0: i32) -> (i32, i32) {
    %c0_i32 = arith.constant 0 : i32
    %c0_i32_0 = arith.constant 0 : i32
    return %arg0, %c0_i32 : i32, i32
  }
  func.func @transform_1(%arg0: i32) -> (i32, i32) {
    %c0_i32 = arith.constant 0 : i32
    %c0_i32_0 = arith.constant 0 : i32
    %c0_i32_1 = arith.constant 0 : i32
    return %c0_i32, %c0_i32_0 : i32, i32
  }
  func.func @transform_2(%arg0: i32) -> (i32, i32) {
    %c0_i32 = arith.constant 0 : i32
    %c0_i32_0 = arith.constant 0 : i32
    %c0_i32_1 = arith.constant 0 : i32
    return %c0_i32, %c0_i32_0 : i32, i32
  }
  func.func @transform_3(%arg0: i32) -> (i32, i32) {
    %c0_i32 = arith.constant 0 : i32
    %c0_i32_0 = arith.constant 0 : i32
    return %arg0, %c0_i32 : i32, i32
  }
}

</mosaic_0001>

<bundles_post_ra>
// kernel: rnn_forward.1
= control target key start
LH: loop header
LB: loop body
LE: loop exit
PB: predicated region body
PF: predicated region fallthrough
CT: control target
= control target key end

     0   :  { %8 = vsyncpa [#allocation3], 0  ;;  %s1096_s0 = inlined_call_operand.vmem [shape: f32[2,1024], index: 0, kind: input, shape index: {}]   ;;  %s1097_s1 = inlined_call_operand.hbm [shape: bf16[1024,128], index: 1, kind: input, shape index: {}]   ;;  %s1098_s2 = inlined_call_operand.vmem [shape: f32[1,128], index: 2, kind: input, shape index: {}]   ;;  %s1099_s3 = inlined_call_operand.hbm [shape: f32[2,128], index: 3, kind: output, shape index: {}]  }
   0x1   :  { %9 = vsyncpa [#allocation4], 0  ;;  %s1050_s12 = smov [#allocation2]  }
   0x2   :  { %s17_s13 = sshll.u32 %s1050_s12, 4  ;;  %s18_s13 = int_to_ptr.vmem [resolvable:$true] %s17_s13 }
   0x3   :  { %s1014_s14 = scalar_lea.vmem %s18_s13, 8192  ;;  %p1019_p1 = scmp.lt.s32.totalorder %s18_s13, %s18_s13 }
   0x4   :  { %p1015_p0 = scmp.ne.s32.totalorder %s18_s13, %s1014_s14  ;;  %p1020_p2 = scmp.lt.s32.totalorder %s1014_s14, %s1014_s14 }
   0x6   :  { %p1021_p3 = por %p1020_p2, %p1019_p1 }
   0x8   :  { %p1022_p4 = pnand %p1021_p3, %p1015_p0 }
   0xa   :  { %1025 = shalt.err (!%p1022_p4)
}
   0xb   :  { %s1051_s15 = smov 64   ;;  %s1052_s16 = smov 4  }
   0xc   :  { %23 = dma.hbm_to_vmem [thread:$0]  %s1097_s1, 8192, %s18_s13, [#allocation3], %s1051_s15, %s1051_s15, %s1052_s16  }
   0xd   :  { %1046 = dma.done.wait [#allocation3], 8192  }
   0xe   :  { %1047 = vsyncadd [#allocation3], 4294959104  ;;  %v938_v0 = vld [vmem:[#allocation2 + $0x78] sm:$0xff]   ;;  %v942_v4 = vld [vmem:[#allocation2 + $0x70] sm:$0xff]   ;;  %v1053_v22 = vmov 1983009808   ;;  %v38_v24 = vlaneseq }
   0xf   :  { %v939_v1 = vld [vmem:[#allocation2 + $0xf8] sm:$0xff]   ;;  %845 = vmatprep.subr.bf16.mxu0 %v938_v0  ;;  %v943_v5 = vld [vmem:[#allocation2 + $0xf0] sm:$0xff]   ;;  %v946_v8 = vld [vmem:[#allocation2 + $0x68] sm:$0xff]   ;;  %v36_v23 = vunpack.c.l.s4 %v1053_v22  ;;  %s1054_s23 = smov [#allocation5]  }
  0x10   :  { %v940_v2 = vld [vmem:[#allocation2 + $0x38] sm:$0xff]   ;;  %867 = vmatprep.subr.bf16.mxu1 %v939_v1  ;;  %v944_v6 = vld [vmem:[#allocation2 + $0x30] sm:$0xff]   ;;  %v947_v9 = vld [vmem:[#allocation2 + $0xe8] sm:$0xff]   ;;  %v39_v30 = vshrl.u32 %v38_v24, 7  ;;  %s771_s24 = sshll.u32 %s1054_s23, 4  ;;  %s772_s24 = int_to_ptr.vmem [resolvable:$true] %s771_s24 }
  0x11   :  { %v941_v3 = vld [vmem:[#allocation2 + $0xb8] sm:$0xff]   ;;  %846 = vmatpush3.bf16.msra.mxu0 %v940_v2  ;;  %v945_v7 = vld [vmem:[#allocation2 + $0xb0] sm:$0xff]   ;;  %v948_v10 = vld [vmem:[#allocation2 + $0x28] sm:$0xff]   ;;  %v37_v29 = vunpack.c.0.s8 %v36_v23  ;;  %p1031_p6 = scmp.lt.s32.totalorder %s772_s24, %s772_s24 }
  0x12   :  { %868 = vmatpush3.bf16.msra.mxu1 %v941_v3  ;;  %847 = vmatprep.subr.bf16.mxu0 %v942_v4  ;;  %v949_v11 = vld [vmem:[#allocation2 + $0xa8] sm:$0xff]   ;;  %v950_v12 = vld [vmem:[#allocation2 + $0x60] sm:$0xff]   ;;  %v954_v16 = vld [vmem:[#allocation2 + $0x58] sm:$0xff]  }
  0x13   :  { %869 = vmatprep.subr.bf16.mxu1 %v943_v5  ;;  %v951_v13 = vld [vmem:[#allocation2 + $0xe0] sm:$0xff]   ;;  %v955_v17 = vld [vmem:[#allocation2 + $0xd8] sm:$0xff]   ;;  %v958_v20 = vld [vmem:[#allocation2 + $0x50] sm:$0xff]   ;;  %v1078_v35 = vsub.s32 %v37_v29, %v39_v30 }
  0x14   :  { %v952_v14 = vld [vmem:[#allocation2 + $0x20] sm:$0xff]   ;;  %v956_v18 = vld [vmem:[#allocation2 + $0x18] sm:$0xff]   ;;  %v959_v21 = vld [vmem:[#allocation2 + $0xd0] sm:$0xff]  }
  0x15   :  { %848 = vmatpush3.bf16.msra.mxu0 %v944_v6  ;;  %v953_v15 = vld [vmem:[#allocation2 + $0xa0] sm:$0xff]   ;;  %v957_v19 = vld [vmem:[#allocation2 + $0x98] sm:$0xff]   ;;  %v960_v25 = vld [vmem:[#allocation2 + $0x10] sm:$0xff]  }
  0x16   :  { %870 = vmatpush3.bf16.msra.mxu1 %v945_v7  ;;  %849 = vmatprep.subr.bf16.mxu0 %v946_v8  ;;  %v961_v26 = vld [vmem:[#allocation2 + $0x90] sm:$0xff]   ;;  %v962_v27 = vld [vmem:[#allocation2 + $0x48] sm:$0xff]   ;;  %v966_v33 = vld [vmem:[#allocation2 + $0x40] sm:$0xff]  }
  0x17   :  { %871 = vmatprep.subr.bf16.mxu1 %v947_v9  ;;  %v963_v28 = vld [vmem:[#allocation2 + $0xc8] sm:$0xff]   ;;  %v967_v34 = vld [vmem:[#allocation2 + $0xc0] sm:$0xff]   ;;  %v971_v41 = vld [vmem:[#allocation2 + $0x178] sm:$0xff]  }
  0x18   :  { %v964_v31 = vld [vmem:[#allocation2 + $0x8] sm:$0xff]   ;;  %v968_v36 = vld [vmem:[#allocation2] sm:$0xff]   ;;  %v972_v42 = vld [vmem:[#allocation2 + $0x1f8] sm:$0xff]  }
  0x19   :  { %850 = vmatpush3.bf16.msra.mxu0 %v948_v10  ;;  %v965_v32 = vld [vmem:[#allocation2 + $0x88] sm:$0xff]   ;;  %v969_v37 = vld [vmem:[#allocation2 + $0x80] sm:$0xff]   ;;  %v973_v48 = vld [vmem:[#allocation2 + $0x138] sm:$0xff]  }
  0x1a   :  { %872 = vmatpush3.bf16.msra.mxu1 %v949_v11  ;;  %851 = vmatprep.subr.bf16.mxu0 %v950_v12  ;;  %v30_v38 = vld [vmem:[%s1096_s0] sm:$0xff]  ;;  %v975_v50 = vld [vmem:[#allocation2 + $0x170] sm:$0xff]   ;;  %v974_v52 = vld [vmem:[#allocation2 + $0x1b8] sm:$0xff]  }
  0x1b   :  { %873 = vmatprep.subr.bf16.mxu1 %v951_v13  ;;  %v41_v39 = vrot.slane %v30_v38, %v1078_v35  ;;  %v34_v40 = vcombine.high %v30_v38, %v30_v38  ;;  %v976_v53 = vld [vmem:[#allocation2 + $0x1f0] sm:$0xff]   ;;  %v979_v55 = vld [vmem:[#allocation2 + $0x168] sm:$0xff]   ;;  %v983_v59 = vld [vmem:[#allocation2 + $0x160] sm:$0xff]  }
  0x1c   :  { %v977_v54 = vld [vmem:[#allocation2 + $0x130] sm:$0xff]   ;;  %v980_v57 = vld [vmem:[#allocation2 + $0x1e8] sm:$0xff]   ;;  %v984_v61 = vld [vmem:[#allocation2 + $0x1e0] sm:$0xff]  }
  0x1d   :  { %852 = vmatpush3.bf16.msra.mxu0 %v952_v14  ;;  %v49_v43 = vcombine.high %v41_v39, %v41_v39  ;;  %v48_v44 = vrot.slane %v34_v40, %v1078_v35  ;;  %v76_v45 = vpack.c.bf16 %v41_v39, %v41_v39  ;;  %v978_v56 = vld [vmem:[#allocation2 + $0x1b0] sm:$0xff]   ;;  %v981_v58 = vld [vmem:[#allocation2 + $0x128] sm:$0xff]   ;;  %v985_v62 = vld [vmem:[#allocation2 + $0x120] sm:$0xff]  }
  0x1e   :  { %874 = vmatpush3.bf16.msra.mxu1 %v953_v15  ;;  %853 = vmatprep.subr.bf16.mxu0 %v954_v16  ;;  %v982_v60 = vld [vmem:[#allocation2 + $0x1a8] sm:$0xff]   ;;  %v987_v63 = vld [vmem:[#allocation2 + $0x158] sm:$0xff]   ;;  %v986_v0 = vld [vmem:[#allocation2 + $0x1a0] sm:$0xff]  }
  0x1f   :  { %875 = vmatprep.subr.bf16.mxu1 %v955_v17  ;;  %v77_v46 = vpack.c.bf16 %v49_v43, %v49_v43  ;;  %v50_v47 = vcombine.high %v48_v44, %v48_v44  ;;  %v78_v49 = vpack.c.bf16 %v48_v44, %v48_v44  ;;  %v988_v1 = vld [vmem:[#allocation2 + $0x1d8] sm:$0xff]   ;;  %v991_v3 = vld [vmem:[#allocation2 + $0x150] sm:$0xff]   ;;  %v995_v7 = vld [vmem:[#allocation2 + $0x148] sm:$0xff]  }
  0x20   :  { %v989_v2 = vld [vmem:[#allocation2 + $0x118] sm:$0xff]   ;;  %v992_v5 = vld [vmem:[#allocation2 + $0x1d0] sm:$0xff]   ;;  %v996_v9 = vld [vmem:[#allocation2 + $0x1c8] sm:$0xff]  }
  0x21   :  { %854 = vmatpush3.bf16.msra.mxu0 %v956_v18  ;;  %635 = vmatprep.mubr.bf16.mxu0 %v77_v46  ;;  %v79_v51 = vpack.c.bf16 %v50_v47, %v50_v47  ;;  %v990_v4 = vld [vmem:[#allocation2 + $0x198] sm:$0xff]   ;;  %v993_v6 = vld [vmem:[#allocation2 + $0x110] sm:$0xff]   ;;  %v997_v10 = vld [vmem:[#allocation2 + $0x108] sm:$0xff]  }
  0x22   :  { %876 = vmatpush3.bf16.msra.mxu1 %v957_v19  ;;  %855 = vmatprep.subr.bf16.mxu0 %v958_v20  ;;  %v994_v8 = vld [vmem:[#allocation2 + $0x190] sm:$0xff]   ;;  %v999_v11 = vld [vmem:[#allocation2 + $0x140] sm:$0xff]   ;;  %v998_v12 = vld [vmem:[#allocation2 + $0x188] sm:$0xff]  }
  0x23   :  { %877 = vmatprep.subr.bf16.mxu1 %v959_v21  ;;  %675 = vmatprep.mubr.bf16.mxu1 %v79_v51  ;;  %v1000_v13 = vld [vmem:[#allocation2 + $0x1c0] sm:$0xff]   ;;  %v31_v14 = vld [vmem:[%s1096_s0 + $0x8] sm:$0xff] }
  0x24   :  { %v1001_v15 = vld [vmem:[#allocation2 + $0x100] sm:$0xff]   ;;  %v58_v16 = vrot.slane %v31_v14, %v1078_v35  ;;  %v51_v17 = vcombine.high %v31_v14, %v31_v14 }
  0x25   :  { %856 = vmatpush3.bf16.msra.mxu0 %v960_v25  ;;  %v1002_v18 = vld [vmem:[#allocation2 + $0x180] sm:$0xff]  }
  0x26   :  { %878 = vmatpush3.bf16.msra.mxu1 %v961_v26  ;;  %857 = vmatprep.subr.bf16.mxu0 %v962_v27  ;;  %v66_v19 = vcombine.high %v58_v16, %v58_v16  ;;  %v65_v20 = vrot.slane %v51_v17, %v1078_v35  ;;  %v80_v21 = vpack.c.bf16 %v58_v16, %v58_v16  ;;  %v780_v35 = vld [vmem:[%s1098_s2] ss:$0 sm:$0xff]  ;;  %s1026_s2 = scalar_lea.vmem %s772_s24, 32 }
  0x27   :  { %879 = vmatprep.subr.bf16.mxu1 %v963_v28  ;;  %p1027_p5 = scmp.ne.s32.totalorder %s772_s24, %s1026_s2  ;;  %p1032_p7 = scmp.lt.s32.totalorder %s1026_s2, %s1026_s2 }
  0x28   :  { %v81_v22 = vpack.c.bf16 %v66_v19, %v66_v19  ;;  %v67_v23 = vcombine.high %v65_v20, %v65_v20  ;;  %v82_v24 = vpack.c.bf16 %v65_v20, %v65_v20 }
  0x29   :  { %858 = vmatpush3.bf16.msra.mxu0 %v964_v31  ;;  %p1033_p8 = por %p1032_p7, %p1031_p6 }
  0x2a   :  { %880 = vmatpush3.bf16.msra.mxu1 %v965_v32  ;;  %859 = vmatprep.subr.bf16.mxu0 %v966_v33  ;;  %v83_v25 = vpack.c.bf16 %v67_v23, %v67_v23 }
  0x2b   :  { %881 = vmatprep.subr.bf16.mxu1 %v967_v34  ;;  %p1034_p9 = pnand %p1033_p8, %p1027_p5 }
  0x2d   :  { %860 = vmatpush3.bf16.msra.mxu0 %v968_v36 }
  0x2e   :  { %882 = vmatpush3.bf16.msra.mxu1 %v969_v37  ;;  %889 = vmatprep.subr.bf16.mxu0 %v971_v41 }
  0x2f   :  { %911 = vmatprep.subr.bf16.mxu1 %v972_v42 }
  0x30   :  { %636 = vmatmul.mubr.bf16.vlgmr.msra.gmra.mxu0 %v76_v45 }
  0x31   :  { %890 = vmatpush3.bf16.msra.mxu0 %v973_v48  ;;  %676 = vmatmul.mubr.bf16.vlgmr.msra.gmra.mxu1 %v78_v49 }
  0x32   :  { %891 = vmatprep.subr.bf16.mxu0 %v975_v50  ;;  %912 = vmatpush3.bf16.msra.mxu1 %v974_v52 }
  0x33   :  { %913 = vmatprep.subr.bf16.mxu1 %v976_v53  ;;  %715 = vmatprep.mubr.bf16.mxu0 %v81_v22 }
  0x34   :  { %755 = vmatprep.mubr.bf16.mxu1 %v83_v25 }
  0x35   :  { %892 = vmatpush3.bf16.msra.mxu0 %v977_v54 }
  0x36   :  { %893 = vmatprep.subr.bf16.mxu0 %v979_v55  ;;  %914 = vmatpush3.bf16.msra.mxu1 %v978_v56 }
  0x37   :  { %915 = vmatprep.subr.bf16.mxu1 %v980_v57 }
  0x39   :  { %894 = vmatpush3.bf16.msra.mxu0 %v981_v58 }
  0x3a   :  { %895 = vmatprep.subr.bf16.mxu0 %v983_v59  ;;  %916 = vmatpush3.bf16.msra.mxu1 %v982_v60 }
  0x3b   :  { %917 = vmatprep.subr.bf16.mxu1 %v984_v61 }
  0x3d   :  { %896 = vmatpush3.bf16.msra.mxu0 %v985_v62 }
  0x3e   :  { %897 = vmatprep.subr.bf16.mxu0 %v987_v63  ;;  %918 = vmatpush3.bf16.msra.mxu1 %v986_v0 }
  0x3f   :  { %919 = vmatprep.subr.bf16.mxu1 %v988_v1 }
  0x41   :  { %898 = vmatpush3.bf16.msra.mxu0 %v989_v2 }
  0x42   :  { %899 = vmatprep.subr.bf16.mxu0 %v991_v3  ;;  %920 = vmatpush3.bf16.msra.mxu1 %v990_v4 }
  0x43   :  { %921 = vmatprep.subr.bf16.mxu1 %v992_v5 }
  0x45   :  { %900 = vmatpush3.bf16.msra.mxu0 %v993_v6 }
  0x46   :  { %901 = vmatprep.subr.bf16.mxu0 %v995_v7  ;;  %922 = vmatpush3.bf16.msra.mxu1 %v994_v8 }
  0x47   :  { %923 = vmatprep.subr.bf16.mxu1 %v996_v9 }
  0x49   :  { %902 = vmatpush3.bf16.msra.mxu0 %v997_v10 }
  0x4a   :  { %903 = vmatprep.subr.bf16.mxu0 %v999_v11  ;;  %924 = vmatpush3.bf16.msra.mxu1 %v998_v12 }
  0x4b   :  { %925 = vmatprep.subr.bf16.mxu1 %v1000_v13 }
  0x4d   :  { %904 = vmatpush3.bf16.msra.mxu0 %v1001_v15 }
  0x4e   :  { %926 = vmatpush3.bf16.msra.mxu1 %v1002_v18 }
  0x50   :  { %716 = vmatmul.mubr.bf16.vlgmr.msra.gmra.mxu0 %v80_v21 }
  0x51   :  { %756 = vmatmul.mubr.bf16.vlgmr.msra.gmra.mxu1 %v82_v24 }
  0xf0   :  { %v861_v26 = vpop.f32.mrf.mxu0 }
  0xf1   :  { %v883_v27 = vpop.f32.mrf.mxu1 }
  0xf2   :  { %v862_v28 = vpop.f32.mrf.mxu0 }
  0xf3   :  { %v884_v29 = vpop.f32.mrf.mxu1  ;;  %v863_v34 = vadd.f32 %v862_v28, %v861_v26 }
  0xf4   :  { %v864_v30 = vpop.f32.mrf.mxu0  ;;  %v885_v37 = vadd.f32 %v884_v29, %v883_v27 }
  0xf5   :  { %v886_v31 = vpop.f32.mrf.mxu1  ;;  %v638_v36 = vadd.f32 %v863_v34, %v780_v35 }
  0xf6   :  { %v865_v32 = vpop.f32.mrf.mxu0 }
  0xf7   :  { %v887_v33 = vpop.f32.mrf.mxu1  ;;  %v678_v41 = vadd.f32 %v885_v37, %v638_v36 }
 0x110   :  { %v905_v38 = vpop.f32.mrf.mxu0 }
 0x111   :  { %v927_v39 = vpop.f32.mrf.mxu1 }
 0x112   :  { %v906_v40 = vpop.f32.mrf.mxu0 }
 0x113   :  { %v907_v42 = vadd.f32 %v906_v40, %v905_v38  ;;  %v928_v43 = vpop.f32.mrf.mxu1 }
 0x114   :  { %v908_v44 = vpop.f32.mrf.mxu0  ;;  %v929_v46 = vadd.f32 %v928_v43, %v927_v39 }
 0x115   :  { %v718_v45 = vadd.f32 %v907_v42, %v678_v41  ;;  %v930_v47 = vpop.f32.mrf.mxu1 }
 0x116   :  { %v909_v48 = vpop.f32.mrf.mxu0 }
 0x117   :  { %v758_v49 = vadd.f32 %v929_v46, %v718_v45  ;;  %v931_v50 = vpop.f32.mrf.mxu1 }
 0x119   :  { %1004 = vtanh.f32 %v758_v49 }
 0x126   :  { %v1005_v51 = vpop.eup %1004 }
 0x127   :  { %764 = vst [vmem:[#allocation5] sm:$0x3] %v1005_v51 }
 0x128   :  { %1037 = shalt.err (!%p1034_p9)
}
 0x129   :  { %774 = dma.vmem_to_hbm [thread:$0]  %s772_s24, 32, %s1099_s3, [#allocation4]  }
 0x12a   :  { %1048 = dma.done.wait [#allocation4], 32  }
 0x12b   :  { %1049 = vsyncadd [#allocation4], 4294967264 }
 0x12c   :  { %778 = vsyncpa [#allocation3], 1 }
 0x12d   :  { %779 = vsyncpa [#allocation4], 1 }

</bundles_post_ra>
